<compile_context>
chip_gen: v7x
topology: tpu7x:2x2x1
jax: 0.10.0
libtpu: 0.0.40
codegen_flags: <defaults>
</compile_context>

<pallas_src>
import math
import functools

import jax
import jax.numpy as jnp
from jax.experimental import pallas as pl
from jax.experimental.pallas import tpu as pltpu

_LANES = 128                    # vreg lane width
_SUBLANES = 8                   # vreg sublane count (f32)
_FLAT_COLS = 8 * _LANES         # lane-dense slab width for the fallback path
_XLA_FALLBACK_BYTES = 1 << 20   # below this, a fused XLA elementwise hits roofline


# ----------------------------------------------------------------------------
# Kernel body (shared by both paths): out = x * scale + pe, computed in f32.
# pe_ref broadcasts against x_ref ((tS,1,D) vs (tS,tB,D) on the aligned path,
# identical shapes on the flattened path).
# ----------------------------------------------------------------------------
def _pos_enc_kernel(x_ref, pe_ref, o_ref, *, scale):
    xf = x_ref[...].astype(jnp.float32)
    pf = pe_ref[...].astype(jnp.float32)
    o_ref[...] = (xf * scale + pf).astype(o_ref.dtype)


def make_sinusoid_pe(max_len: int, d_model: int) -> jnp.ndarray:
    """Deterministic sinusoid table, identical to PyTorch set_pe(). (L, 1, D)."""
    position = jnp.arange(0, max_len, dtype=jnp.float32)[:, None]          # (L, 1)
    div_term = jnp.exp(
        jnp.arange(0, d_model, 2, dtype=jnp.float32)
        * (-math.log(10000.0) / d_model)
    )                                                                       # (D/2,)
    angles = position * div_term                                            # (L, D/2)
    pe = jnp.zeros((max_len, d_model), dtype=jnp.float32)
    pe = pe.at[:, 0::2].set(jnp.sin(angles))
    pe = pe.at[:, 1::2].set(jnp.cos(angles))
    return pe[:, None, :]                                                   # (L, 1, D)


def _vmem_budget():
    """(block-bytes budget, vmem_limit_bytes) sized per TPU generation."""
    cap = 64 << 20  # conservative default (works on v5e/v6e/v7x)
    try:
        info = pltpu.get_tpu_info()
        c = int(getattr(info, "vmem_capacity_bytes", 0) or 0)
        if c > 0:
            cap = c
    except Exception:
        pass
    cap = max(32 << 20, min(cap, 128 << 20))
    return cap // 4, cap // 2


def _choose_tiles_3d(S, B, D, itemsize, budget):
    """Pick (tS, tB) so x/out blocks (double-buffered) + pe block fit in VMEM.
    tB is either the full batch or a multiple of 8 (sublane-friendly)."""
    def block_bytes(tS, tB):
        # 2x(x) + 2x(out) + 2x(pe) buffers
        return (4 * tS * tB * D + 2 * tS * D) * itemsize

    for tB in [B] + [t for t in (512, 256, 128, 64, 32, 16, 8) if t < B]:
        max_ts = budget // ((4 * tB + 2) * D * itemsize)
        tS = int(min(max_ts, S, 1024))
        if tS >= 8:
            tS = (tS // 8) * 8
        if tS >= min(S, 8) and block_bytes(tS, tB) <= budget:
            return tS, tB
    return min(S, 8), min(B, 8)   # tiny fallback; vmem_limit is raised anyway


def _pos_enc_3d(x, pe, mult, donate_x, budget, vmem_limit):
    """Lane-aligned path (d_model % 128 == 0): tile over (seq, batch)."""
    S, B, D = x.shape
    dt = x.dtype
    itemsize = jnp.dtype(dt).itemsize
    pe_t = pe.astype(dt)                      # full (max_len, 1, D) table; rows
                                              # selected by the index_map (no pe[:S] slice)
    tS, tB = _choose_tiles_3d(S, B, D, itemsize, budget)
    grid = (pl.cdiv(S, tS), pl.cdiv(B, tB))   # batch innermost -> pe tile stays resident

    return pl.pallas_call(
        functools.partial(_pos_enc_kernel, scale=mult),
        out_shape=jax.ShapeDtypeStruct((S, B, D), dt),
        grid_spec=pltpu.PrefetchScalarGridSpec(
            num_scalar_prefetch=0,
            grid=grid,
            in_specs=[
                pl.BlockSpec((tS, tB, D), lambda i, j: (i, j, 0)),
                pl.BlockSpec((tS, 1, D), lambda i, j: (i, 0, 0)),   # ignores batch axis
            ],
            out_specs=pl.BlockSpec((tS, tB, D), lambda i, j: (i, j, 0)),
        ),
        compiler_params=pltpu.CompilerParams(
            dimension_semantics=("parallel", "parallel"),
            vmem_limit_bytes=vmem_limit,
        ),
        input_output_aliases=({0: 0} if donate_x else {}),
    )(x, pe_t)


def _pos_enc_flat(x, pe, mult, donate_x, budget, vmem_limit):
    """Lane-dense fallback for d_model not a multiple of 128 (e.g. d_model=32):
    broadcast pe over batch, flatten to a (rows, 1024) slab so stores are
    unmasked full-lane vst's and sublanes are fully occupied, tile over rows."""
    S, B, D = x.shape
    dt = x.dtype
    itemsize = jnp.dtype(dt).itemsize

    pe_b = jnp.broadcast_to(pe[:S].astype(dt), (S, B, D)).reshape(-1)
    xf = x.reshape(-1)
    n = S * B * D
    chunk = _SUBLANES * _FLAT_COLS                 # keep rows a multiple of 8
    n_pad = ((n + chunk - 1) // chunk) * chunk
    if n_pad != n:
        xf = jnp.pad(xf, (0, n_pad - n))
        pe_b = jnp.pad(pe_b, (0, n_pad - n))
    rows = n_pad // _FLAT_COLS
    x2 = xf.reshape(rows, _FLAT_COLS)
    p2 = pe_b.reshape(rows, _FLAT_COLS)

    # x + pe + out blocks, double-buffered each
    t_rows = (budget // (6 * _FLAT_COLS * itemsize)) // _SUBLANES * _SUBLANES
    t_rows = max(_SUBLANES, min(t_rows, rows))
    grid = (pl.cdiv(rows, t_rows),)

    out = pl.pallas_call(
        functools.partial(_pos_enc_kernel, scale=mult),
        out_shape=jax.ShapeDtypeStruct((rows, _FLAT_COLS), dt),
        grid_spec=pltpu.PrefetchScalarGridSpec(
            num_scalar_prefetch=0,
            grid=grid,
            in_specs=[
                pl.BlockSpec((t_rows, _FLAT_COLS), lambda i: (i, 0)),
                pl.BlockSpec((t_rows, _FLAT_COLS), lambda i: (i, 0)),
            ],
            out_specs=pl.BlockSpec((t_rows, _FLAT_COLS), lambda i: (i, 0)),
        ),
        compiler_params=pltpu.CompilerParams(
            dimension_semantics=("parallel",),
            vmem_limit_bytes=vmem_limit,
        ),
        input_output_aliases=({0: 0} if donate_x else {}),
    )(x2, p2)
    return out.reshape(-1)[:n].reshape(S, B, D)


def positional_encoding(x: jnp.ndarray,
                        pe: jnp.ndarray,
                        d_model: int,
                        scale: bool = True,
                        *,
                        donate_x: bool = False,
                        force_pallas: bool = False) -> jnp.ndarray:
    """x: (seq_len, batch, d_model); pe: (max_len, 1, d_model) from make_sinusoid_pe."""
    S, B, D = x.shape
    assert D == d_model, "last dim of x must equal d_model"
    assert S <= pe.shape[0], "seq_len exceeds max_len of the pe table"
    mult = float(math.sqrt(d_model)) if scale else 1.0

    # Tiny inputs: a fused XLA elementwise already sits at the HBM roofline;
    # the Pallas kernel only pays off above a size threshold.
    if not force_pallas and x.size * jnp.dtype(x.dtype).itemsize < _XLA_FALLBACK_BYTES:
        return (x.astype(jnp.float32) * mult
                + pe[:S].astype(jnp.float32)).astype(x.dtype)

    budget, vmem_limit = _vmem_budget()
    if D % _LANES == 0:
        return _pos_enc_3d(x, pe, mult, donate_x, budget, vmem_limit)
    return _pos_enc_flat(x, pe, mult, donate_x, budget, vmem_limit)


if __name__ == "__main__":
    key = jax.random.PRNGKey(0)
    k1, k2 = jax.random.split(key)

    # --- Module-sized demo: d_model=32 (< 128 -> lane-dense flattened path) ---
    d_model, max_len = 32, 100
    seq_len, batch = 8, 2
    x = jax.random.normal(k1, (seq_len, batch, d_model), dtype=jnp.float32)
    pe = make_sinusoid_pe(max_len, d_model)
    out = positional_encoding(x, pe, d_model, scale=True, force_pallas=True)
    out = jax.block_until_ready(out)
    ref = x * math.sqrt(d_model) + pe[:seq_len]
    assert out.shape == (seq_len, batch, d_model)
    assert jnp.allclose(out, ref, atol=1e-5, rtol=1e-5)

    # --- Lane-aligned production path: d_model multiple of 128 (tiled 3-D) ---
    d_model2, max_len2 = 128, 100
    seq_len2, batch2 = 16, 8
    x2 = jax.random.normal(k2, (seq_len2, batch2, d_model2), dtype=jnp.float32)
    pe2 = make_sinusoid_pe(max_len2, d_model2)
    out2 = positional_encoding(x2, pe2, d_model2, scale=True, force_pallas=True)
    out2 = jax.block_until_ready(out2)
    ref2 = x2 * math.sqrt(d_model2) + pe2[:seq_len2]
    assert jnp.allclose(out2, ref2, atol=1e-5, rtol=1e-5)

    print("KERNEL_OK")
</pallas_src>

<mosaic_0001>
module attributes {stable_mosaic.version = 11 : i64} {
  func.func @_pos_enc_kernel(%arg0: i32, %arg1: memref<8x1024xf32, #tpu.memory_space<vmem>>, %arg2: memref<8x1024xf32, #tpu.memory_space<vmem>>, %arg3: memref<8x1024xf32, #tpu.memory_space<vmem>>) attributes {dimension_semantics = [#tpu.dimension_semantics<parallel>], iteration_bounds = array<i64: 1>, scalar_prefetch = 0 : i64, scratch_operands = 0 : i64, tpu.core_type = #tpu.core_type<tc>, window_params = [{transform_indices = @transform_0, window_bounds = array<i64: 8, 1024>}, {transform_indices = @transform_1, window_bounds = array<i64: 8, 1024>}, {transform_indices = @transform_2, window_bounds = array<i64: 8, 1024>}]} {
    %c0 = arith.constant 0 : index
    %c0_0 = arith.constant 0 : index
    %0 = vector.load %arg1[%c0, %c0_0] : memref<8x1024xf32, #tpu.memory_space<vmem>>, vector<8x1024xf32>
    %c0_1 = arith.constant 0 : index
    %c0_2 = arith.constant 0 : index
    %1 = vector.load %arg2[%c0_1, %c0_2] : memref<8x1024xf32, #tpu.memory_space<vmem>>, vector<8x1024xf32>
    %cst = arith.constant 5.65685415 : f32
    %2 = vector.broadcast %cst : f32 to vector<8x1024xf32>
    %3 = arith.mulf %0, %2 : vector<8x1024xf32>
    %4 = arith.addf %3, %1 : vector<8x1024xf32>
    %c0_3 = arith.constant 0 : index
    %c0_4 = arith.constant 0 : index
    %5 = vector.load %arg3[%c0_3, %c0_4] : memref<8x1024xf32, #tpu.memory_space<vmem>>, vector<8x1024xf32>
    tpu.vector_store %arg3[%c0_3, %c0_4], %4 {strides = array<i32>} : memref<8x1024xf32, #tpu.memory_space<vmem>>, vector<8x1024xf32>,
    return
  }
  func.func @transform_0(%arg0: i32) -> (i32, i32) {
    %c0_i32 = arith.constant 0 : i32
    %c0_i32_0 = arith.constant 0 : i32
    return %arg0, %c0_i32 : i32, i32
  }
  func.func @transform_1(%arg0: i32) -> (i32, i32) {
    %c0_i32 = arith.constant 0 : i32
    %c0_i32_0 = arith.constant 0 : i32
    return %arg0, %c0_i32 : i32, i32
  }
  func.func @transform_2(%arg0: i32) -> (i32, i32) {
    %c0_i32 = arith.constant 0 : i32
    %c0_i32_0 = arith.constant 0 : i32
    return %arg0, %c0_i32 : i32, i32
  }
}

</mosaic_0001>

<bundles_post_ra>
// kernel: tpu_custom_call.1
= control target key start
LH: loop header
LB: loop body
LE: loop exit
PB: predicated region body
PF: predicated region fallthrough
CT: control target
= control target key end

     0   :  { %7 = vsyncpa [#allocation3], 0  ;;  %s221_s0 = inlined_call_operand.hbm [shape: f32[8,1024], index: 0, kind: input, shape index: {}]   ;;  %s222_s1 = inlined_call_operand.hbm [shape: f32[8,1024], index: 1, kind: input, shape index: {}]   ;;  %s223_s2 = inlined_call_operand.hbm [shape: f32[8,1024], index: 2, kind: output, shape index: {}]  }
   0x1   :  { %8 = vsyncpa [#allocation6], 0 }
   0x2   :  { %9 = vsyncpa [#allocation4], 0  ;;  %s167_s9 = smov [#allocation2]   ;;  %s168_s11 = smov [#allocation5]  }
   0x3   :  { %s16_s10 = sshll.u32 %s167_s9, 4  ;;  %s26_s12 = sshll.u32 %s168_s11, 4  ;;  %s17_s10 = int_to_ptr.vmem [resolvable:$true] %s16_s10  ;;  %s27_s12 = int_to_ptr.vmem [resolvable:$true] %s26_s12 }
   0x4   :  { %s95_s15 = scalar_lea.hbm %s221_s0, 1024 }
   0x5   :  { %p96_p0 = scmp.ne.s32.totalorder %s221_s0, %s95_s15  ;;  %p99_p1 = scmp.lt.u32.totalorder %s95_s15, %s221_s0 }
   0x7   :  { %p101_p2 = pnand %p99_p1, %p96_p0 }
   0x9   :  { %104 = shalt.err (!%p101_p2)
}
   0xa   :  { %s105_s20 = scalar_lea.vmem %s17_s10, 1024  ;;  %p110_p4 = scmp.lt.s32.totalorder %s17_s10, %s17_s10 }
   0xb   :  { %p106_p3 = scmp.ne.s32.totalorder %s17_s10, %s105_s20  ;;  %p111_p5 = scmp.lt.s32.totalorder %s105_s20, %s105_s20 }
   0xd   :  { %p112_p6 = por %p111_p5, %p110_p4 }
   0xf   :  { %p113_p7 = pnand %p112_p6, %p106_p3 }
  0x11   :  { %116 = shalt.err (!%p113_p7)
}
  0x12   :  { %19 = dma.hbm_to_vmem [thread:$0]  %s221_s0, 1024, %s17_s10, [#allocation3]  }
  0x13   :  { %s117_s25 = scalar_lea.hbm %s222_s1, 1024 }
  0x14   :  { %p118_p8 = scmp.ne.s32.totalorder %s222_s1, %s117_s25  ;;  %p121_p9 = scmp.lt.u32.totalorder %s117_s25, %s222_s1 }
  0x16   :  { %p123_p10 = pnand %p121_p9, %p118_p8 }
  0x18   :  { %126 = shalt.err (!%p123_p10)
}
  0x19   :  { %s127_s30 = scalar_lea.vmem %s27_s12, 1024  ;;  %p132_p12 = scmp.lt.s32.totalorder %s27_s12, %s27_s12 }
  0x1a   :  { %p128_p11 = scmp.ne.s32.totalorder %s27_s12, %s127_s30  ;;  %p133_p13 = scmp.lt.s32.totalorder %s127_s30, %s127_s30 }
  0x1c   :  { %p134_p0 = por %p133_p13, %p132_p12 }
  0x1e   :  { %p135_p1 = pnand %p134_p0, %p128_p11 }
  0x20   :  { %138 = shalt.err (!%p135_p1)
}
  0x21   :  { %29 = dma.hbm_to_vmem [thread:$0]  %s222_s1, 1024, %s27_s12, [#allocation6]  }
  0x22   :  { %161 = dma.done.wait [#allocation3], 1024  }
  0x23   :  { %162 = vsyncadd [#allocation3], 4294966272 }
  0x24   :  { %163 = dma.done.wait [#allocation6], 1024  }
  0x25   :  { %164 = vsyncadd [#allocation6], 4294966272  ;;  %v36_v0 = vld [vmem:[#allocation2] sm:$0xff]  ;;  %v37_v2 = vld [vmem:[#allocation2 + $0x8] sm:$0xff]  ;;  %s169_s1 = smov [#allocation7]  }
  0x26   :  { %v44_v1 = vld [vmem:[#allocation5] sm:$0xff]  ;;  %v52_v3 = vmul.f32 5.656854, %v36_v0  ;;  %v45_v4 = vld [vmem:[#allocation5 + $0x8] sm:$0xff]  ;;  %v53_v5 = vmul.f32 5.656854, %v37_v2 }
  0x27   :  { %v38_v6 = vld [vmem:[#allocation2 + $0x10] sm:$0xff]  ;;  %v39_v9 = vld [vmem:[#allocation2 + $0x18] sm:$0xff]  ;;  %v40_v14 = vld [vmem:[#allocation2 + $0x20] sm:$0xff]  ;;  %s82_s4 = sshll.u32 %s169_s1, 4  ;;  %s83_s4 = int_to_ptr.vmem [resolvable:$true] %s82_s4 }
  0x28   :  { %v46_v7 = vld [vmem:[#allocation5 + $0x10] sm:$0xff]  ;;  %v54_v8 = vmul.f32 5.656854, %v38_v6  ;;  %v47_v10 = vld [vmem:[#allocation5 + $0x18] sm:$0xff]  ;;  %v60_v11 = vadd.f32 %v52_v3, %v44_v1  ;;  %v61_v12 = vadd.f32 %v53_v5, %v45_v4  ;;  %v55_v13 = vmul.f32 5.656854, %v39_v9  ;;  %p144_p3 = scmp.lt.s32.totalorder %s83_s4, %s83_s4 }
  0x29   :  { %v48_v15 = vld [vmem:[#allocation5 + $0x20] sm:$0xff]  ;;  %v41_v16 = vld [vmem:[#allocation2 + $0x28] sm:$0xff]  ;;  %v56_v18 = vmul.f32 5.656854, %v40_v14  ;;  %v42_v21 = vld [vmem:[#allocation2 + $0x30] sm:$0xff]  ;;  %s139_s5 = scalar_lea.vmem %s83_s4, 1024 }
  0x2a   :  { %v62_v17 = vadd.f32 %v54_v8, %v46_v7  ;;  %v49_v19 = vld [vmem:[#allocation5 + $0x28] sm:$0xff]  ;;  %v57_v20 = vmul.f32 5.656854, %v41_v16  ;;  %68 = vst [vmem:[#allocation7] sm:$0xff] %v60_v11  ;;  %69 = vst [vmem:[#allocation7 + $0x8] sm:$0xff] %v61_v12  ;;  %v63_v22 = vadd.f32 %v55_v13, %v47_v10  ;;  %v50_v23 = vld [vmem:[#allocation5 + $0x30] sm:$0xff]  ;;  %p140_p2 = scmp.ne.s32.totalorder %s83_s4, %s139_s5  ;;  %p145_p4 = scmp.lt.s32.totalorder %s139_s5, %s139_s5 }
  0x2b   :  { %v58_v24 = vmul.f32 5.656854, %v42_v21  ;;  %v43_v25 = vld [vmem:[#allocation2 + $0x38] sm:$0xff]  ;;  %v64_v27 = vadd.f32 %v56_v18, %v48_v15 }
  0x2c   :  { %v51_v26 = vld [vmem:[#allocation5 + $0x38] sm:$0xff]  ;;  %70 = vst [vmem:[#allocation7 + $0x10] sm:$0xff] %v62_v17  ;;  %v65_v28 = vadd.f32 %v57_v20, %v49_v19  ;;  %v59_v29 = vmul.f32 5.656854, %v43_v25  ;;  %71 = vst [vmem:[#allocation7 + $0x18] sm:$0xff] %v63_v22  ;;  %p146_p5 = por %p145_p4, %p144_p3 }
  0x2d   :  { %v66_v30 = vadd.f32 %v58_v24, %v50_v23  ;;  %72 = vst [vmem:[#allocation7 + $0x20] sm:$0xff] %v64_v27 }
  0x2e   :  { %73 = vst [vmem:[#allocation7 + $0x28] sm:$0xff] %v65_v28  ;;  %v67_v31 = vadd.f32 %v59_v29, %v51_v26  ;;  %p147_p6 = pnand %p146_p5, %p140_p2 }
  0x2f   :  { %74 = vst [vmem:[#allocation7 + $0x30] sm:$0xff] %v66_v30 }
  0x30   :  { %75 = vst [vmem:[#allocation7 + $0x38] sm:$0xff] %v67_v31 }
  0x31   :  { %150 = shalt.err (!%p147_p6)
}
  0x32   :  { %s151_s8 = scalar_lea.hbm %s223_s2, 1024 }
  0x33   :  { %p152_p7 = scmp.ne.s32.totalorder %s223_s2, %s151_s8  ;;  %p155_p8 = scmp.lt.u32.totalorder %s151_s8, %s223_s2 }
  0x35   :  { %p157_p9 = pnand %p155_p8, %p152_p7 }
  0x37   :  { %160 = shalt.err (!%p157_p9)
}
  0x38   :  { %85 = dma.vmem_to_hbm [thread:$0]  %s83_s4, 1024, %s223_s2, [#allocation4]  }
  0x39   :  { %165 = dma.done.wait [#allocation4], 1024  }
  0x3a   :  { %166 = vsyncadd [#allocation4], 4294966272 }
  0x3b   :  { %89 = vsyncpa [#allocation3], 1 }
  0x3c   :  { %90 = vsyncpa [#allocation6], 1 }
  0x3d   :  { %91 = vsyncpa [#allocation4], 1 }

</bundles_post_ra>
